<compile_context>
chip_gen: v7x
topology: tpu7x:2x2x1
jax: 0.10.0
libtpu: 0.0.40
codegen_flags: <defaults>
</compile_context>

<pallas_src>
import functools

import jax
import jax.numpy as jnp
import numpy as np
from jax.experimental import pallas as pl
from jax.experimental.pallas import tpu as pltpu


def _round_up(x, m):
    return (x + m - 1) // m * m


def _deinterleave(x):
    # (..., D) -> concat(x[..., 0::2], x[..., 1::2]) along last dim
    return jnp.concatenate([x[..., 0::2], x[..., 1::2]], axis=-1)


# --------------------------------------------------------------------------
# Kernel 1: rotate the user table once (per-row Givens rotation + norm term)
# --------------------------------------------------------------------------
def rotate_table_kernel(emb_ref, rot_ref, out_ref, sqn_ref, *, c):
    D = emb_ref.shape[-1]
    H = D // 2
    xe = emb_ref[:, :H]          # even components
    xo = emb_ref[:, H:]          # odd components
    re = rot_ref[:, :H]
    ro = rot_ref[:, H:]
    # One EUP rsqrt + two VPU muls instead of sqrt + two divides.
    inv = jax.lax.rsqrt(re * re + ro * ro)
    ce = re * inv
    se = ro * inv
    # givens_rotations: y0 = g0*x0 - g1*x1 ; y1 = g0*x1 + g1*x0
    ye = ce * xe - se * xo
    yo = ce * xo + se * xe
    out_ref[...] = jnp.concatenate([ye, yo], axis=-1)
    sqn_ref[...] = jnp.sqrt(jnp.sum(ye * ye + yo * yo, axis=-1, keepdims=True) + c)


def _rotate_table(emb_d, rot_d, c, block_r):
    n, D = emb_d.shape
    kern = functools.partial(rotate_table_kernel, c=float(c))
    return pl.pallas_call(
        kern,
        out_shape=(jax.ShapeDtypeStruct((n, D), jnp.float32),
                   jax.ShapeDtypeStruct((n, 1), jnp.float32)),
        grid_spec=pltpu.PrefetchScalarGridSpec(
            num_scalar_prefetch=0,
            grid=(n // block_r,),
            in_specs=[pl.BlockSpec((block_r, D), lambda i: (i, 0)),
                      pl.BlockSpec((block_r, D), lambda i: (i, 0))],
            out_specs=[pl.BlockSpec((block_r, D), lambda i: (i, 0)),
                       pl.BlockSpec((block_r, 1), lambda i: (i, 0))]),
        compiler_params=pltpu.CompilerParams(
            dimension_semantics=("parallel",),
            vmem_limit_bytes=32 * 1024 * 1024),
    )(emb_d, rot_d)


# --------------------------------------------------------------------------
# Kernel 2: hyperboloid similarity score + logsigmoid loss over a batch tile
# --------------------------------------------------------------------------
def hyp_loss_kernel(fr_ref, to_ref, ng_ref,            # rotated rows
                    x2_ref, y2p_ref, y2n_ref,          # sqrt(|.|^2 + c) terms
                    bfr_ref, bto_ref, bng_ref,         # biases
                    mask_ref,                          # (TB, 1) validity mask
                    loss_ref,                          # (1, 8, 128) partial
                    *, c):
    fr = fr_ref[...]                                   # (TB, D)
    to = to_ref[...]                                   # (TB, D)
    ng = ng_ref[...]                                   # (TB, N, D)

    dot_p = jnp.sum(fr * to, axis=-1, keepdims=True)   # (TB, 1)
    # Small N per block: VPU broadcast-mul + XLU reduce.  Switch to
    # lax.dot_general (MXU, batch=TB, contract=D) when N per block >= 128.
    dot_n = jnp.sum(fr[:, None, :] * ng, axis=-1)      # (TB, N)

    x2 = x2_ref[...]                                   # (TB, 1)
    bfr = bfr_ref[...]                                 # (TB, 1)
    two_c = 2.0 * c
    # uv = <x,y> - sqrt(|x|^2+c)*sqrt(|y|^2+c);  score = 2c + 2uv + biases
    pos = two_c + 2.0 * (dot_p - x2 * y2p_ref[...]) + bfr + bto_ref[...]   # (TB, 1)
    neg = two_c + 2.0 * (dot_n - x2 * y2n_ref[...]) + bfr + bng_ref[...]   # (TB, N)

    def log_sigmoid(z):
        # stable: logsigmoid(z) = min(z, 0) - log(1 + exp(-|z|))
        return jnp.minimum(z, 0.0) - jnp.log(1.0 + jnp.exp(-jnp.abs(z)))

    m = mask_ref[...]                                  # (TB, 1)
    tile_loss = -(jnp.sum(log_sigmoid(pos) * m) + jnp.sum(log_sigmoid(-neg) * m))
    loss_ref[...] = jnp.full(loss_ref.shape, tile_loss, dtype=jnp.float32)


def _pick_batch_tile(n_neg, dim, vmem_budget_bytes=8 * 1024 * 1024):
    # Size the batch tile so the double-buffered input blocks (dominated by the
    # (TB, N, D) negatives) stay within a budget that is safe even on v7x's
    # smaller VMEM (64 MiB physical / 32 MiB default scoped).
    per_row_bytes = 4 * (n_neg * dim + 2 * dim + 3 * n_neg + 5)
    tb = vmem_budget_bytes // (2 * per_row_bytes)
    tb = max(8, (tb // 8) * 8)
    return int(min(tb, 256))


# --------------------------------------------------------------------------
# Wrapper
# --------------------------------------------------------------------------
def hyp_user_embedding_forward(graph, neg_key, user_emb, rot0, rot1,
                               bias_fr_w, bias_to_w, c, n_neg, block_b=None):
    """graph: (B, 2) int32 node-pair indices. Returns (scalar loss, negs)."""
    n_user, dim = user_emb.shape
    B = graph.shape[0]
    frs = graph[:, 0].astype(jnp.int32)
    tos = graph[:, 1].astype(jnp.int32)
    # get_neg_samples (uniform random negatives)
    negs = jax.random.randint(neg_key, (B, n_neg), 0, n_user, dtype=jnp.int32)

    # ---- precompute rotated tables + norm terms once: O(n_user*D) not O(B*N*D)
    block_r = min(256, _round_up(n_user, 8))
    n_pad = _round_up(n_user, block_r)

    def pad_rows(t, fill):
        return jnp.pad(t, ((0, n_pad - n_user), (0, 0)), constant_values=fill)

    emb_d = pad_rows(_deinterleave(user_emb), 0.0)
    rot0_d = pad_rows(_deinterleave(rot0), 1.0)   # pad rot with 1 -> no NaN rows
    rot1_d = pad_rows(_deinterleave(rot1), 1.0)
    fr_tab, fr_sqn = _rotate_table(emb_d, rot0_d, c, block_r)   # rot0 applied
    to_tab, to_sqn = _rotate_table(emb_d, rot1_d, c, block_r)   # rot1 applied

    # ---- batch tiling / padding + validity mask
    if block_b is None:
        block_b = min(_pick_batch_tile(n_neg, dim), max(8, _round_up(B, 8)))
    B_pad = _round_up(B, block_b)
    pad_b = B_pad - B
    frs_p = jnp.pad(frs, (0, pad_b))
    tos_p = jnp.pad(tos, (0, pad_b))
    negs_p = jnp.pad(negs, ((0, pad_b), (0, 0)))
    mask = (jnp.arange(B_pad) < B).astype(jnp.float32)[:, None]   # (B_pad, 1)

    # ---- gathers from the already-rotated tables (half the bytes of before:
    # no separate rotation-vector gather, no per-occurrence rotation work).
    # TODO(synk): fuse these row gathers into the kernel's DMA pipeline via
    # PrefetchScalarGridSpec + per-row make_async_copy from an HBM-resident
    # table, to avoid materializing the (B, N, D) negative block in HBM.
    fr = fr_tab[frs_p]                       # (B_pad, D)
    to = to_tab[tos_p]                       # (B_pad, D)
    ng = to_tab[negs_p]                      # (B_pad, N, D)
    x2 = fr_sqn[frs_p]                       # (B_pad, 1)
    y2p = to_sqn[tos_p]                      # (B_pad, 1)
    y2n = to_sqn[negs_p][..., 0]             # (B_pad, N)
    bfr = bias_fr_w[frs_p]                   # (B_pad, 1)
    bto = bias_to_w[tos_p]                   # (B_pad, 1)
    bng = bias_to_w[negs_p][..., 0]          # (B_pad, N)

    G = B_pad // block_b
    D = dim
    N = n_neg
    row2 = lambda i: (i, 0)
    row3 = lambda i: (i, 0, 0)
    kern = functools.partial(hyp_loss_kernel, c=float(c))

    partials = pl.pallas_call(
        kern,
        out_shape=jax.ShapeDtypeStruct((G, 8, 128), jnp.float32),
        grid_spec=pltpu.PrefetchScalarGridSpec(
            num_scalar_prefetch=0,
            grid=(G,),
            in_specs=[
                pl.BlockSpec((block_b, D), row2),      # fr
                pl.BlockSpec((block_b, D), row2),      # to
                pl.BlockSpec((block_b, N, D), row3),   # ng
                pl.BlockSpec((block_b, 1), row2),      # x2
                pl.BlockSpec((block_b, 1), row2),      # y2p
                pl.BlockSpec((block_b, N), row2),      # y2n
                pl.BlockSpec((block_b, 1), row2),      # bias_fr
                pl.BlockSpec((block_b, 1), row2),      # bias_to
                pl.BlockSpec((block_b, N), row2),      # bias_ng
                pl.BlockSpec((block_b, 1), row2),      # mask
            ],
            out_specs=pl.BlockSpec((1, 8, 128), row3),
        ),
        compiler_params=pltpu.CompilerParams(
            dimension_semantics=("parallel",),          # shards over v7x's 2 TCs
            vmem_limit_bytes=32 * 1024 * 1024),
    )(fr, to, ng, x2, y2p, y2n, bfr, bto, bng, mask)

    loss = jnp.sum(partials[:, 0, 0])
    return loss, negs


# --------------------------------------------------------------------------
# Pure-JAX reference (mirrors the PyTorch module exactly)
# --------------------------------------------------------------------------
def _givens_rotations_ref(r, x):
    N, D = r.shape
    g = r.reshape(N, D // 2, 2)
    g = g / jnp.linalg.norm(g, axis=-1, keepdims=True)
    xp = x.reshape(N, D // 2, 2)
    x_rot = (g[..., 0:1] * xp
             + g[..., 1:2] * jnp.concatenate([-xp[..., 1:2], xp[..., 0:1]], axis=-1))
    return x_rot.reshape(N, D)


def ref_forward(graph, negs, user_emb, rot0, rot1, bias_fr_w, bias_to_w, c):
    frs = graph[:, 0:1]
    tos = graph[:, 1:2]

    def get_emb(idx, rot):
        cv = user_emb[idx]                              # (B, T, D)
        B, T, D = cv.shape
        rv = rot[idx]
        return _givens_rotations_ref(rv.reshape(-1, D), cv.reshape(-1, D)).reshape(B, T, D)

    def sim(x, y):
        x2 = jnp.sqrt(jnp.sum(x * x, -1, keepdims=True) + c)
        y2 = -jnp.sqrt(jnp.sum(y * y, -1, keepdims=True) + c)
        u = jnp.concatenate([x, x2], -1)
        v = jnp.concatenate([y, y2], -1)
        uv = jnp.einsum('bid,bjd->bij', u, v)
        return -(-2.0 * c - 2.0 * uv)

    def score(fr_idx, to_idx):
        cv = get_emb(fr_idx, rot0)
        tv = get_emb(to_idx, rot1)
        d = sim(cv, tv)
        bf = bias_fr_w[fr_idx]                            # (B, T_fr, 1)
        bt = jnp.transpose(bias_to_w[to_idx], (0, 2, 1))  # (B, 1, T_to)
        return d + bf + bt

    pos = score(frs, tos)
    neg = score(frs, negs)
    return -(jnp.sum(jax.nn.log_sigmoid(pos)) + jnp.sum(jax.nn.log_sigmoid(-neg)))


# --------------------------------------------------------------------------
if __name__ == "__main__":
    key = jax.random.PRNGKey(0)
    k_emb, k_rot0, k_rot1, k_bf, k_bt, k_graph, k_neg = jax.random.split(key, 7)

    n_user, dim = 64, 128        # dim even (Givens pairs); lane-dense last dim
    B, n_neg = 64, 8
    c = 1.0

    user_emb = jax.random.normal(k_emb, (n_user, dim), jnp.float32) * 0.1
    rot0 = jax.random.normal(k_rot0, (n_user, dim), jnp.float32)
    rot1 = jax.random.normal(k_rot1, (n_user, dim), jnp.float32)
    # Module init zero-fills the biases; use small nonzero values here so the
    # bias path of the forward is actually exercised.
    bias_fr_w = jax.random.normal(k_bf, (n_user, 1), jnp.float32) * 0.01
    bias_to_w = jax.random.normal(k_bt, (n_user, 1), jnp.float32) * 0.01

    graph = jax.random.randint(k_graph, (B, 2), 0, n_user, dtype=jnp.int32)

    loss, negs = hyp_user_embedding_forward(
        graph, k_neg, user_emb, rot0, rot1, bias_fr_w, bias_to_w, c, n_neg,
        block_b=16)                       # grid of 4 batch tiles
    loss = jax.block_until_ready(loss)

    ref = ref_forward(graph, negs, user_emb, rot0, rot1, bias_fr_w, bias_to_w, c)
    ref = jax.block_until_ready(ref)

    np.testing.assert_allclose(np.array(loss), np.array(ref), rtol=1e-3, atol=1e-2)
    print("KERNEL_OK")
</pallas_src>

<mosaic_0001>
module attributes {stable_mosaic.version = 11 : i64} {
  func.func @rotate_table_kernel(%arg0: i32, %arg1: memref<64x128xf32, #tpu.memory_space<vmem>>, %arg2: memref<64x128xf32, #tpu.memory_space<vmem>>, %arg3: memref<64x128xf32, #tpu.memory_space<vmem>>, %arg4: memref<64x1xf32, #tpu.memory_space<vmem>>) attributes {dimension_semantics = [#tpu.dimension_semantics<parallel>], iteration_bounds = array<i64: 1>, scalar_prefetch = 0 : i64, scratch_operands = 0 : i64, tpu.core_type = #tpu.core_type<tc>, window_params = [{transform_indices = @transform_0, window_bounds = array<i64: 64, 128>}, {transform_indices = @transform_1, window_bounds = array<i64: 64, 128>}, {transform_indices = @transform_2, window_bounds = array<i64: 64, 128>}, {transform_indices = @transform_3, window_bounds = array<i64: 64, 1>}]} {
    %c0 = arith.constant 0 : index
    %c0_0 = arith.constant 0 : index
    %0 = vector.load %arg1[%c0, %c0_0] : memref<64x128xf32, #tpu.memory_space<vmem>>, vector<64x64xf32>
    %c0_1 = arith.constant 0 : index
    %c64 = arith.constant 64 : index
    %1 = vector.load %arg1[%c0_1, %c64] : memref<64x128xf32, #tpu.memory_space<vmem>>, vector<64x64xf32>
    %c0_2 = arith.constant 0 : index
    %c0_3 = arith.constant 0 : index
    %2 = vector.load %arg2[%c0_2, %c0_3] : memref<64x128xf32, #tpu.memory_space<vmem>>, vector<64x64xf32>
    %c0_4 = arith.constant 0 : index
    %c64_5 = arith.constant 64 : index
    %3 = vector.load %arg2[%c0_4, %c64_5] : memref<64x128xf32, #tpu.memory_space<vmem>>, vector<64x64xf32>
    %4 = arith.mulf %2, %2 : vector<64x64xf32>
    %5 = arith.mulf %3, %3 : vector<64x64xf32>
    %6 = arith.addf %4, %5 : vector<64x64xf32>
    %7 = math.rsqrt %6 : vector<64x64xf32>
    %8 = arith.mulf %2, %7 : vector<64x64xf32>
    %9 = arith.mulf %3, %7 : vector<64x64xf32>
    %10 = arith.mulf %8, %0 : vector<64x64xf32>
    %11 = arith.mulf %9, %1 : vector<64x64xf32>
    %12 = arith.subf %10, %11 : vector<64x64xf32>
    %13 = arith.mulf %8, %1 : vector<64x64xf32>
    %14 = arith.mulf %9, %0 : vector<64x64xf32>
    %15 = arith.addf %13, %14 : vector<64x64xf32>
    %16 = tpu.concatenate %12, %15 in 1 : vector<64x64xf32>, vector<64x64xf32> -> vector<64x128xf32>
    %c0_6 = arith.constant 0 : index
    %c0_7 = arith.constant 0 : index
    %17 = vector.load %arg3[%c0_6, %c0_7] : memref<64x128xf32, #tpu.memory_space<vmem>>, vector<64x128xf32>
    tpu.vector_store %arg3[%c0_6, %c0_7], %16 {strides = array<i32>} : memref<64x128xf32, #tpu.memory_space<vmem>>, vector<64x128xf32>,
    %18 = arith.mulf %12, %12 : vector<64x64xf32>
    %19 = arith.mulf %15, %15 : vector<64x64xf32>
    %20 = arith.addf %18, %19 : vector<64x64xf32>
    %cst = arith.constant dense<0.000000e+00> : vector<64xf32>
    %21 = vector.multi_reduction <add>, %20, %cst [1] : vector<64x64xf32> to vector<64xf32>
    %22 = vector.shape_cast %21 : vector<64xf32> to vector<64x1xf32>
    %cst_8 = arith.constant 1.000000e+00 : f32
    %23 = vector.broadcast %cst_8 : f32 to vector<64x1xf32>
    %24 = arith.addf %22, %23 : vector<64x1xf32>
    %25 = math.sqrt %24 : vector<64x1xf32>
    %c0_9 = arith.constant 0 : index
    %c0_10 = arith.constant 0 : index
    %26 = vector.load %arg4[%c0_9, %c0_10] : memref<64x1xf32, #tpu.memory_space<vmem>>, vector<64x1xf32>
    tpu.vector_store %arg4[%c0_9, %c0_10], %25 {strides = array<i32>} : memref<64x1xf32, #tpu.memory_space<vmem>>, vector<64x1xf32>,
    return
  }
  func.func @transform_0(%arg0: i32) -> (i32, i32) {
    %c0_i32 = arith.constant 0 : i32
    %c0_i32_0 = arith.constant 0 : i32
    return %arg0, %c0_i32 : i32, i32
  }
  func.func @transform_1(%arg0: i32) -> (i32, i32) {
    %c0_i32 = arith.constant 0 : i32
    %c0_i32_0 = arith.constant 0 : i32
    return %arg0, %c0_i32 : i32, i32
  }
  func.func @transform_2(%arg0: i32) -> (i32, i32) {
    %c0_i32 = arith.constant 0 : i32
    %c0_i32_0 = arith.constant 0 : i32
    return %arg0, %c0_i32 : i32, i32
  }
  func.func @transform_3(%arg0: i32) -> (i32, i32) {
    %c0_i32 = arith.constant 0 : i32
    %c0_i32_0 = arith.constant 0 : i32
    return %arg0, %c0_i32 : i32, i32
  }
}

</mosaic_0001>

<bundles_post_ra>
// kernel: tpu_custom_call.1
= control target key start
LH: loop header
LB: loop body
LE: loop exit
PB: predicated region body
PF: predicated region fallthrough
CT: control target
= control target key end

     0   :  { %9 = vsyncpa [#allocation3], 0  ;;  %s1020_s0 = inlined_call_operand.hbm [shape: f32[64,128], index: 0, kind: input, shape index: {}]   ;;  %s1021_s1 = inlined_call_operand.hbm [shape: f32[64,128], index: 1, kind: input, shape index: {}]   ;;  %s1022_s2 = inlined_call_operand.hbm [shape: f32[64,128], index: 2, kind: output, shape index: {0}]   ;;  %s1023_s3 = inlined_call_operand.vmem [shape: f32[64,1], index: 3, kind: output, shape index: {1}]  }
   0x1   :  { %10 = vsyncpa [#allocation6], 0 }
   0x2   :  { %11 = vsyncpa [#allocation4], 0  ;;  %s608_s12 = smov [#allocation2]   ;;  %s536_s16 = scalar_lea.hbm %s1020_s0, 1024 }
   0x3   :  { %s17_s13 = sshll.u32 %s608_s12, 4  ;;  %p537_p0 = scmp.ne.s32.totalorder %s1020_s0, %s536_s16  ;;  %s18_s13 = int_to_ptr.vmem [resolvable:$true] %s17_s13 }
   0x4   :  { %p540_p1 = scmp.lt.u32.totalorder %s536_s16, %s1020_s0 }
   0x6   :  { %p542_p2 = pnand %p540_p1, %p537_p0 }
   0x8   :  { %545 = shalt.err (!%p542_p2)
}
   0x9   :  { %s546_s21 = scalar_lea.vmem %s18_s13, 1024  ;;  %p551_p4 = scmp.lt.s32.totalorder %s18_s13, %s18_s13 }
   0xa   :  { %p547_p3 = scmp.ne.s32.totalorder %s18_s13, %s546_s21  ;;  %p552_p5 = scmp.lt.s32.totalorder %s546_s21, %s546_s21 }
   0xc   :  { %p553_p6 = por %p552_p5, %p551_p4 }
   0xe   :  { %p554_p7 = pnand %p553_p6, %p547_p3 }
  0x10   :  { %557 = shalt.err (!%p554_p7)
}
  0x11   :  { %s609_s22 = smov 128   ;;  %s610_s23 = smov 8  }
  0x12   :  { %23 = dma.hbm_to_vmem [thread:$0]  %s1020_s0, 1024, %s18_s13, [#allocation3], %s609_s22, %s609_s22, %s610_s23  }
  0x13   :  { %s611_s26 = smov [#allocation5]   ;;  %s558_s30 = scalar_lea.hbm %s1021_s1, 1024 }
  0x14   :  { %s29_s27 = sshll.u32 %s611_s26, 4  ;;  %p559_p8 = scmp.ne.s32.totalorder %s1021_s1, %s558_s30  ;;  %s30_s27 = int_to_ptr.vmem [resolvable:$true] %s29_s27 }
  0x15   :  { %p562_p9 = scmp.lt.u32.totalorder %s558_s30, %s1021_s1 }
  0x17   :  { %p564_p10 = pnand %p562_p9, %p559_p8 }
  0x19   :  { %567 = shalt.err (!%p564_p10)
}
  0x1a   :  { %s568_s8 = scalar_lea.vmem %s30_s27, 1024  ;;  %p573_p12 = scmp.lt.s32.totalorder %s30_s27, %s30_s27 }
  0x1b   :  { %p569_p11 = scmp.ne.s32.totalorder %s30_s27, %s568_s8  ;;  %p574_p13 = scmp.lt.s32.totalorder %s568_s8, %s568_s8 }
  0x1d   :  { %p575_p0 = por %p574_p13, %p573_p12 }
  0x1f   :  { %p576_p1 = pnand %p575_p0, %p569_p11 }
  0x21   :  { %579 = shalt.err (!%p576_p1)
}
  0x22   :  { %35 = dma.hbm_to_vmem [thread:$0]  %s1021_s1, 1024, %s30_s27, [#allocation6], %s609_s22, %s609_s22, %s610_s23  }
  0x23   :  { %602 = dma.done.wait [#allocation3], 1024  }
  0x24   :  { %603 = vsyncadd [#allocation3], 4294966272 }
  0x25   :  { %604 = dma.done.wait [#allocation6], 1024  }
  0x26   :  { %605 = vsyncadd [#allocation6], 4294966272  ;;  %v664_v0 = vld [vmem:[#allocation5] sm:$0xff]  ;;  %v666_v1 = vld [vmem:[#allocation5 + $0x10] sm:$0xff]  ;;  %s612_s10 = smov 64   ;;  %vm338_vm0 = vcmask 523264  }
  0x27   :  { %v668_v2 = vld [vmem:[#allocation5 + $0x8] sm:$0xff]  ;;  %v58_v3 = vmul.f32 %v664_v0, %v664_v0  ;;  %v60_v4 = vmul.f32 %v666_v1, %v666_v1  ;;  %v674_v5 = vld [vmem:[#allocation5 + $0x18] sm:$0xff]  ;;  %v682_v8 = vld [vmem:[#allocation5 + $0x20] sm:$0xff]  ;;  %vm467_vm1 = vcmask 7168   ;;  %s613_s12 = smov [#allocation7]  }
  0x28   :  { %v59_v6 = vmul.f32 %v668_v2, %v668_v2  ;;  %v61_v7 = vmul.f32 %v674_v5, %v674_v5  ;;  %v684_v9 = vld [vmem:[#allocation5 + $0x28] sm:$0xff]  ;;  %v62_v10 = vmul.f32 %v682_v8, %v682_v8  ;;  %v692_v12 = vld [vmem:[#allocation5 + $0x30] sm:$0xff]  ;;  %v694_v13 = vld [vmem:[#allocation5 + $0x38] sm:$0xff]  ;;  %s481_s13 = sshll.u32 %s613_s12, 4  ;;  %s934_s13 = int_to_ptr.vmem [resolvable:$true] %s481_s13 }
  0x29   :  { %74 = vrot.lane.b32.xlu0 %v58_v3, %s612_s10  ;;  %78 = vrot.lane.b32.xlu1 %v60_v4, %s612_s10  ;;  %v63_v11 = vmul.f32 %v684_v9, %v684_v9  ;;  %v64_v14 = vmul.f32 %v692_v12, %v692_v12  ;;  %v65_v15 = vmul.f32 %v694_v13, %v694_v13  ;;  %v704_v16 = vld [vmem:[#allocation2] sm:$0xff]  ;;  %v706_v17 = vld [vmem:[#allocation2 + $0x8] sm:$0xff]  ;;  %v712_v18 = vld [vmem:[#allocation2 + $0x10] sm:$0xff]  ;;  %s580_s16 = scalar_lea.vmem %s934_s13, 1024  ;;  %p585_p3 = scmp.lt.s32.totalorder %s934_s13, %s934_s13 }
  0x2a   :  { %v714_v19 = vld [vmem:[#allocation2 + $0x18] sm:$0xff]  ;;  %v720_v20 = vld [vmem:[#allocation2 + $0x20] sm:$0xff]  ;;  %v722_v21 = vld [vmem:[#allocation2 + $0x28] sm:$0xff]  ;;  %p581_p2 = scmp.ne.s32.totalorder %s934_s13, %s580_s16  ;;  %p586_p4 = scmp.lt.s32.totalorder %s580_s16, %s580_s16 }
  0x2b   :  { %v758_v46 = vld [vmem:[#allocation2 + $0x30] sm:$0xff]  ;;  %v764_v47 = vld [vmem:[#allocation2 + $0x38] sm:$0xff] }
  0x2c   :  { %p587_p5 = por %p586_p4, %p585_p3 }
  0x2d   :  { %76 = vrot.lane.b32.xlu0 %v59_v6, %s612_s10  ;;  %80 = vrot.lane.b32.xlu1 %v61_v7, %s612_s10 }
  0x2e   :  { %p588_p6 = pnand %p587_p5, %p581_p2 }
  0x31   :  { %82 = vrot.lane.b32.xlu0 %v62_v10, %s612_s10  ;;  %84 = vrot.lane.b32.xlu1 %v63_v11, %s612_s10 }
  0x35   :  { %86 = vrot.lane.b32.xlu0 %v64_v14, %s612_s10  ;;  %88 = vrot.lane.b32.xlu1 %v65_v15, %s612_s10 }
  0x39   :  { %226 = vrot.lane.b32.xlu0 %v704_v16, %s612_s10  ;;  %228 = vrot.lane.b32.xlu1 %v706_v17, %s612_s10 }
  0x3d   :  { %230 = vrot.lane.b32.xlu0 %v712_v18, %s612_s10  ;;  %232 = vrot.lane.b32.xlu1 %v714_v19, %s612_s10 }
  0x41   :  { %234 = vrot.lane.b32.xlu0 %v720_v20, %s612_s10  ;;  %236 = vrot.lane.b32.xlu1 %v722_v21, %s612_s10 }
  0x9b   :  { %v75_v22 = vpop.permute.xlu0 %74  ;;  %v79_v23 = vpop.permute.xlu1 %78 }
  0x9c   :  { %v98_v24 = vadd.f32 %v75_v22, %v58_v3  ;;  %v100_v25 = vadd.f32 %v79_v23, %v60_v4 }
  0x9e   :  { %504 = vrsqrt.f32 %v98_v24 }
  0x9f   :  { %v77_v26 = vpop.permute.xlu0 %76  ;;  %v81_v27 = vpop.permute.xlu1 %80  ;;  %506 = vrsqrt.f32 %v100_v25 }
  0xa0   :  { %v99_v28 = vadd.f32 %v77_v26, %v59_v6  ;;  %v101_v29 = vadd.f32 %v81_v27, %v61_v7 }
  0xa2   :  { %508 = vrsqrt.f32 %v99_v28 }
  0xa3   :  { %v83_v30 = vpop.permute.xlu0 %82  ;;  %v85_v31 = vpop.permute.xlu1 %84  ;;  %510 = vrsqrt.f32 %v101_v29 }
  0xa4   :  { %v102_v32 = vadd.f32 %v83_v30, %v62_v10  ;;  %v103_v33 = vadd.f32 %v85_v31, %v63_v11 }
  0xa6   :  { %512 = vrsqrt.f32 %v102_v32 }
  0xa7   :  { %v87_v34 = vpop.permute.xlu0 %86  ;;  %v89_v35 = vpop.permute.xlu1 %88  ;;  %514 = vrsqrt.f32 %v103_v33 }
  0xa8   :  { %v728_v36 = vpop.eup %504  ;;  %v104_v37 = vadd.f32 %v87_v34, %v64_v14  ;;  %v105_v38 = vadd.f32 %v89_v35, %v65_v15 }
  0xa9   :  { %130 = vrot.lane.b32.xlu0 %v728_v36, %s612_s10  ;;  %v732_v39 = vpop.eup %506 }
  0xaa   :  { %516 = vrsqrt.f32 %v104_v37 }
  0xab   :  { %518 = vrsqrt.f32 %v105_v38  ;;  %v768_v48 = vpop.permute.xlu0 %226  ;;  %v770_v49 = vpop.permute.xlu1 %228 }
  0xac   :  { %v734_v40 = vpop.eup %508 }
  0xad   :  { %132 = vrot.lane.b32.xlu1 %v734_v40, %s612_s10  ;;  %134 = vrot.lane.b32.xlu0 %v732_v39, %s612_s10  ;;  %v740_v41 = vpop.eup %510 }
  0xaf   :  { %v772_v50 = vpop.permute.xlu0 %230  ;;  %v774_v51 = vpop.permute.xlu1 %232 }
  0xb0   :  { %v742_v42 = vpop.eup %512 }
  0xb1   :  { %136 = vrot.lane.b32.xlu1 %v740_v41, %s612_s10  ;;  %138 = vrot.lane.b32.xlu0 %v742_v42, %s612_s10  ;;  %v748_v43 = vpop.eup %514 }
  0xb3   :  { %v776_v52 = vpop.permute.xlu0 %234  ;;  %v778_v53 = vpop.permute.xlu1 %236 }
  0xb4   :  { %v750_v44 = vpop.eup %516 }
  0xb5   :  { %140 = vrot.lane.b32.xlu1 %v748_v43, %s612_s10  ;;  %142 = vrot.lane.b32.xlu0 %v750_v44, %s612_s10  ;;  %v756_v45 = vpop.eup %518 }
  0xb9   :  { %144 = vrot.lane.b32.xlu1 %v756_v45, %s612_s10  ;;  %238 = vrot.lane.b32.xlu0 %v758_v46, %s612_s10 }
  0xbd   :  { %240 = vrot.lane.b32.xlu1 %v764_v47, %s612_s10 }
 0x11b   :  { %v131_v54 = vpop.permute.xlu0 %130 }
 0x11c   :  { %v154_v55 = vmul.f32 %v131_v54, %v664_v0 }
 0x11e   :  { %v170_v56 = vmul.f32 %v154_v55, %v704_v16  ;;  %v258_v27 = vmul.f32 %v768_v48, %v154_v55 }
 0x11f   :  { %v133_v57 = vpop.permute.xlu1 %132  ;;  %v135_v58 = vpop.permute.xlu0 %134 }
 0x120   :  { %v155_v59 = vmul.f32 %v133_v57, %v668_v2  ;;  %v156_v60 = vmul.f32 %v135_v58, %v666_v1  ;;  %186 = vrot.lane.b32.xlu0 %v170_v56, %s612_s10 }
 0x122   :  { %v171_v61 = vmul.f32 %v155_v59, %v706_v17  ;;  %v172_v62 = vmul.f32 %v156_v60, %v712_v18  ;;  %v259_v29 = vmul.f32 %v770_v49, %v155_v59  ;;  %v260_v30 = vmul.f32 %v772_v50, %v156_v60 }
 0x123   :  { %v137_v63 = vpop.permute.xlu1 %136  ;;  %v139_v3 = vpop.permute.xlu0 %138  ;;  %v114_v59 = vmul.f32 %v728_v36, %v664_v0  ;;  %v117_v0 = vmul.f32 %v740_v41, %v674_v5  ;;  %v118_v36 = vmul.f32 %v742_v42, %v682_v8 }
 0x124   :  { %v157_v4 = vmul.f32 %v137_v63, %v674_v5  ;;  %v158_v6 = vmul.f32 %v139_v3, %v682_v8  ;;  %188 = vrot.lane.b32.xlu1 %v171_v61, %s612_s10  ;;  %190 = vrot.lane.b32.xlu0 %v172_v62, %s612_s10  ;;  %v115_v63 = vmul.f32 %v734_v40, %v668_v2 }
 0x125   :  { %v250_v62 = vmul.f32 %v768_v48, %v114_v59  ;;  %v116_v3 = vmul.f32 %v732_v39, %v666_v1  ;;  %v253_v39 = vmul.f32 %v774_v51, %v117_v0 }
 0x126   :  { %v173_v7 = vmul.f32 %v157_v4, %v714_v19  ;;  %v174_v10 = vmul.f32 %v158_v6, %v720_v20  ;;  %v261_v31 = vmul.f32 %v774_v51, %v157_v4  ;;  %v262_v32 = vmul.f32 %v776_v52, %v158_v6 }
 0x127   :  { %v141_v11 = vpop.permute.xlu1 %140  ;;  %v143_v14 = vpop.permute.xlu0 %142 }
 0x128   :  { %v159_v15 = vmul.f32 %v141_v11, %v684_v9  ;;  %v160_v22 = vmul.f32 %v143_v14, %v692_v12  ;;  %192 = vrot.lane.b32.xlu1 %v173_v7, %s612_s10  ;;  %194 = vrot.lane.b32.xlu0 %v174_v10, %s612_s10  ;;  %v251_v10 = vmul.f32 %v770_v49, %v115_v63 }
 0x129   :  { %v252_v11 = vmul.f32 %v772_v50, %v116_v3  ;;  %v254_v14 = vmul.f32 %v776_v52, %v118_v36  ;;  %v119_v49 = vmul.f32 %v748_v43, %v684_v9  ;;  %v162_v9 = vmul.f32 %v114_v59, %v704_v16 }
 0x12a   :  { %v175_v23 = vmul.f32 %v159_v15, %v722_v21  ;;  %v176_v24 = vmul.f32 %v160_v22, %v758_v46  ;;  %v263_v34 = vmul.f32 %v778_v53, %v159_v15  ;;  %v164_v52 = vmul.f32 %v116_v3, %v712_v18 }
 0x12b   :  { %v145_v25 = vpop.permute.xlu1 %144  ;;  %v812_v33 = vpop.permute.xlu0 %238  ;;  %v255_v50 = vmul.f32 %v778_v53, %v119_v49  ;;  %v165_v53 = vmul.f32 %v117_v0, %v714_v19  ;;  %v121_v18 = vmul.f32 %v756_v45, %v694_v13 }
 0x12c   :  { %v161_v26 = vmul.f32 %v145_v25, %v694_v13  ;;  %196 = vrot.lane.b32.xlu1 %v175_v23, %s612_s10  ;;  %198 = vrot.lane.b32.xlu0 %v176_v24, %s612_s10  ;;  %v264_v35 = vmul.f32 %v812_v33, %v160_v22 }
 0x12d   :  { %v169_v59 = vmul.f32 %v121_v18, %v764_v47 }
 0x12e   :  { %v177_v28 = vmul.f32 %v161_v26, %v764_v47 }
 0x12f   :  { %v818_v37 = vpop.permute.xlu1 %240 }
 0x130   :  { %200 = vrot.lane.b32.xlu1 %v177_v28, %s612_s10  ;;  %274 = vrot.lane.b32.xlu0 %v258_v27, %s612_s10  ;;  %v265_v38 = vmul.f32 %v818_v37, %v161_v26  ;;  %v163_v27 = vmul.f32 %v115_v63, %v706_v17  ;;  %v166_v17 = vmul.f32 %v118_v36, %v720_v20 }
 0x134   :  { %276 = vrot.lane.b32.xlu1 %v259_v29, %s612_s10  ;;  %278 = vrot.lane.b32.xlu0 %v260_v30, %s612_s10  ;;  %v167_v30 = vmul.f32 %v119_v49, %v722_v21 }
 0x138   :  { %280 = vrot.lane.b32.xlu1 %v261_v31, %s612_s10  ;;  %282 = vrot.lane.b32.xlu0 %v262_v32, %s612_s10 }
 0x13c   :  { %284 = vrot.lane.b32.xlu1 %v263_v34, %s612_s10  ;;  %286 = vrot.lane.b32.xlu0 %v264_v35, %s612_s10  ;;  %v120_v34 = vmul.f32 %v750_v44, %v692_v12 }
 0x13e   :  { %v256_v21 = vmul.f32 %v812_v33, %v120_v34  ;;  %v168_v63 = vmul.f32 %v120_v34, %v758_v46 }
 0x140   :  { %288 = vrot.lane.b32.xlu1 %v265_v38, %s612_s10 }
 0x192   :  { %v187_v54 = vpop.permute.xlu0 %186 }
 0x193   :  { %v855_v43 = vsub.f32 %v162_v9, %v187_v54  ;;  %v257_v54 = vmul.f32 %v818_v37, %v121_v18 }
 0x195   :  { %v355_v23 = vmul.f32 %v855_v43, %v855_v43 }
 0x196   :  { %v189_v55 = vpop.permute.xlu1 %188  ;;  %v191_v56 = vpop.permute.xlu0 %190 }
 0x197   :  { %v860_v24 = vsub.f32 %v164_v52, %v191_v56  ;;  %v211_v29 = vsub.f32 %v163_v27, %v189_v55 }
 0x199   :  { %v357_v16 = vmul.f32 %v860_v24, %v860_v24  ;;  %v356_v56 = vmul.f32 %v211_v29, %v211_v29 }
 0x19a   :  { %v193_v57 = vpop.permute.xlu1 %192  ;;  %v824_v58 = vpop.permute.xlu0 %194 }
 0x19b   :  { %v866_v28 = vsub.f32 %v165_v53, %v193_v57  ;;  %v214_v57 = vsub.f32 %v166_v17, %v824_v58 }
 0x19d   :  { %v358_v13 = vmul.f32 %v866_v28, %v866_v28  ;;  %v359_v33 = vmul.f32 %v214_v57, %v214_v57 }
 0x19e   :  { %v197_v60 = vpop.permute.xlu1 %196  ;;  %v828_v61 = vpop.permute.xlu0 %198 }
 0x19f   :  { %v215_v45 = vsub.f32 %v167_v30, %v197_v60  ;;  %v887_v58 = vsub.f32 %v168_v63, %v828_v61 }
 0x1a1   :  { %v360_v60 = vmul.f32 %v215_v45, %v215_v45 }
 0x1a2   :  { %v835_v4 = vpop.permute.xlu1 %200  ;;  %v275_v6 = vpop.permute.xlu0 %274 }
 0x1a3   :  { %v298_v7 = vadd.f32 %v275_v6, %v250_v62 }
 0x1a5   :  { %314 = vrot.lane.b32.xlu1 %v298_v7, %s612_s10  ;;  %v363_v22 = vmul.f32 %v298_v7, %v298_v7  ;;  %v884_v7 = vsub.f32 %v169_v59, %v835_v4  ;;  %v361_v4 = vmul.f32 %v887_v58, %v887_v58 }
 0x1a6   :  { %v277_v2 = vpop.permute.xlu1 %276  ;;  %v279_v40 = vpop.permute.xlu0 %278 }
 0x1a7   :  { %v299_v48 = vadd.f32 %v277_v2, %v251_v10  ;;  %v300_v1 = vadd.f32 %v279_v40, %v252_v11  ;;  %v371_v26 = vadd.f32 %v363_v22, %v355_v23  ;;  %v362_v2 = vmul.f32 %v884_v7, %v884_v7 }
 0x1a9   :  { %316 = vrot.lane.b32.xlu0 %v299_v48, %s612_s10  ;;  %318 = vrot.lane.b32.xlu1 %v300_v1, %s612_s10  ;;  %v365_v25 = vmul.f32 %v300_v1, %v300_v1  ;;  %v379_v32 = vsel %vm338_vm0, %v371_v26, 0.0  ;;  %v364_v35 = vmul.f32 %v299_v48, %v299_v48 }
 0x1aa   :  { %v281_v5 = vpop.permute.xlu1 %280  ;;  %v283_v41 = vpop.permute.xlu0 %282 }
 0x1ab   :  { %v301_v8 = vadd.f32 %v281_v5, %v253_v39  ;;  %v302_v42 = vadd.f32 %v283_v41, %v254_v14  ;;  %v373_v19 = vadd.f32 %v365_v25, %v357_v16  ;;  %v372_v6 = vadd.f32 %v364_v35, %v356_v56 }
 0x1ad   :  { %320 = vrot.lane.b32.xlu1 %v301_v8, %s612_s10  ;;  %322 = vrot.lane.b32.xlu0 %v302_v42, %s612_s10  ;;  %v366_v31 = vmul.f32 %v301_v8, %v301_v8  ;;  %v385_v20 = vsel %vm338_vm0, %v373_v19, 0.0  ;;  %v367_v37 = vmul.f32 %v302_v42, %v302_v42  ;;  %v382_v46 = vsel %vm338_vm0, %v372_v6, 0.0 }
 0x1ae   :  { %v285_v51 = vpop.permute.xlu1 %284  ;;  %v287_v55 = vpop.permute.xlu0 %286 }
 0x1af   :  { %v303_v15 = vadd.f32 %v285_v51, %v255_v50  ;;  %v374_v62 = vadd.f32 %v366_v31, %v358_v13  ;;  %v304_v3 = vadd.f32 %v287_v55, %v256_v21  ;;  %v375_v36 = vadd.f32 %v367_v37, %v359_v33 }
 0x1b1   :  { %324 = vrot.lane.b32.xlu1 %v303_v15, %s612_s10  ;;  %v368_v12 = vmul.f32 %v303_v15, %v303_v15  ;;  %v388_v10 = vsel %vm338_vm0, %v374_v62, 0.0  ;;  %v369_v0 = vmul.f32 %v304_v3, %v304_v3  ;;  %v391_v48 = vsel %vm338_vm0, %v375_v36, 0.0 }
 0x1b2   :  { %v289_v38 = vpop.permute.xlu1 %288 }
 0x1b3   :  { %v305_v44 = vadd.f32 %v289_v38, %v257_v54  ;;  %v376_v11 = vadd.f32 %v368_v12, %v360_v60  ;;  %v377_v1 = vadd.f32 %v369_v0, %v361_v4 }
 0x1b5   :  { %v370_v47 = vmul.f32 %v305_v44, %v305_v44  ;;  %v394_v40 = vsel %vm338_vm0, %v376_v11, 0.0  ;;  %v397_v14 = vsel %vm338_vm0, %v377_v1, 0.0 }
 0x1b7   :  { %v378_v61 = vadd.f32 %v370_v47, %v362_v2 }
 0x1b9   :  { %v400_v39 = vsel %vm338_vm0, %v378_v61, 0.0 }
 0x1cc   :  { %380 = vadd.xlane.f32.xlu0 %v379_v32 }
 0x1d0   :  { %386 = vadd.xlane.f32.xlu0 %v385_v20 }
 0x1d4   :  { %389 = vadd.xlane.f32.xlu0 %v388_v10 }
 0x1d5   :  { %383 = vadd.xlane.f32.xlu1 %v382_v46 }
 0x1d8   :  { %395 = vadd.xlane.f32.xlu0 %v394_v40 }
 0x1d9   :  { %392 = vadd.xlane.f32.xlu1 %v391_v48 }
 0x1dc   :  { %401 = vadd.xlane.f32.xlu0 %v400_v39 }
 0x1dd   :  { %398 = vadd.xlane.f32.xlu1 %v397_v14 }
 0x1ee   :  { %328 = vrot.lane.b32.xlu1 %v305_v44, %s612_s10 }
 0x1f2   :  { %326 = vrot.lane.b32.xlu0 %v304_v3, %s612_s10 }
 0x217   :  { %v315_v49 = vpop.permute.xlu1 %314 }
 0x218   :  { %v339_v5 = vsel %vm338_vm0, %v855_v43, %v315_v49 }
 0x219   :  { %347 = vst [vmem:[#allocation7] sm:$0xff] %v339_v5 }
 0x21b   :  { %v319_v41 = vpop.permute.xlu1 %318  ;;  %v317_v8 = vpop.permute.xlu0 %316 }
 0x21c   :  { %v341_v42 = vsel %vm338_vm0, %v860_v24, %v319_v41  ;;  %v340_v50 = vsel %vm338_vm0, %v211_v29, %v317_v8 }
 0x21d   :  { %349 = vst [vmem:[#allocation7 + $0x10] sm:$0xff] %v341_v42  ;;  %348 = vst [vmem:[#allocation7 + $0x8] sm:$0xff] %v340_v50 }
 0x21f   :  { %v321_v51 = vpop.permute.xlu1 %320  ;;  %v323_v15 = vpop.permute.xlu0 %322 }
 0x220   :  { %v342_v9 = vsel %vm338_vm0, %v866_v28, %v321_v51  ;;  %v343_v52 = vsel %vm338_vm0, %v214_v57, %v323_v15 }
 0x221   :  { %350 = vst [vmem:[#allocation7 + $0x18] sm:$0xff] %v342_v9  ;;  %351 = vst [vmem:[#allocation7 + $0x20] sm:$0xff] %v343_v52 }
 0x223   :  { %v325_v43 = vpop.permute.xlu1 %324 }
 0x224   :  { %v344_v22 = vsel %vm338_vm0, %v215_v45, %v325_v43 }
 0x225   :  { %352 = vst [vmem:[#allocation7 + $0x28] sm:$0xff] %v344_v22 }
 0x259   :  { %v381_v23 = vpop.xlane.xlu0 %380 }
 0x25a   :  { %v403_v53 = vadd.f32 1.0, %v381_v23 }
 0x25c   :  { %520 = vrsqrt.f32 %v403_v53  ;;  %vm413_vm2 = vcmp.eq.f32.partialorder %v403_v53, inf  ;;  %v416_v34 = vand.u32 2147483648, %v403_v53  ;;  %vm415_vm3 = vcmp.eq.f32.partialorder %v403_v53, 0.0 }
 0x25d   :  { %v387_v24 = vpop.xlane.xlu0 %386 }
 0x25e   :  { %v405_v25 = vadd.f32 1.0, %v387_v24 }
 0x260   :  { %522 = vrsqrt.f32 %v405_v25  ;;  %vm427_vm4 = vcmp.eq.f32.partialorder %v405_v25, inf  ;;  %v430_v56 = vand.u32 2147483648, %v405_v25  ;;  %vm429_vm5 = vcmp.eq.f32.partialorder %v405_v25, 0.0 }
 0x261   :  { %v390_v26 = vpop.xlane.xlu0 %389 }
 0x262   :  { %v910_v27 = vadd.f32 1.0, %v390_v26  ;;  %v384_v16 = vpop.xlane.xlu1 %383 }
 0x263   :  { %v912_v18 = vadd.f32 1.0, %v384_v16 }
 0x264   :  { %524 = vrsqrt.f32 %v910_v27  ;;  %vm434_vm6 = vcmp.eq.f32.partialorder %v910_v27, inf  ;;  %v437_v6 = vand.u32 2147483648, %v910_v27  ;;  %vm436_vm7 = vcmp.eq.f32.partialorder %v910_v27, 0.0 }
 0x265   :  { %526 = vrsqrt.f32 %v912_v18  ;;  %v396_v28 = vpop.xlane.xlu0 %395  ;;  %vm420_vm8 = vcmp.eq.f32.partialorder %v912_v18, inf }
 0x266   :  { %v521_v29 = vpop.eup %520  ;;  %v916_v30 = vadd.f32 1.0, %v396_v28  ;;  %v393_v31 = vpop.xlane.xlu1 %392 }
 0x267   :  { %v412_v32 = vmul.f32 %v521_v29, %v403_v53  ;;  %v918_v19 = vadd.f32 1.0, %v393_v31 }
 0x268   :  { %528 = vrsqrt.f32 %v916_v30 }
 0x269   :  { %v414_v17 = vsel %vm413_vm2, %v403_v53, %v412_v32  ;;  %530 = vrsqrt.f32 %v918_v19  ;;  %v402_v35 = vpop.xlane.xlu0 %401 }
 0x26a   :  { %v523_v38 = vpop.eup %522  ;;  %v417_v54 = vsel %vm415_vm3, %v416_v34, %v414_v17  ;;  %v922_v13 = vadd.f32 1.0, %v402_v35  ;;  %v399_v45 = vpop.xlane.xlu1 %398 }
 0x26b   :  { %468 = vst.msk [vmem:[%s1023_s3] sm:$0xff] %vm467_vm1, %v417_v54  ;;  %v426_v55 = vmul.f32 %v523_v38, %v405_v25  ;;  %v928_v21 = vadd.f32 1.0, %v399_v45 }
 0x26c   :  { %532 = vrsqrt.f32 %v922_v13 }
 0x26d   :  { %v428_v57 = vsel %vm427_vm4, %v405_v25, %v426_v55  ;;  %534 = vrsqrt.f32 %v928_v21  ;;  %v327_v59 = vpop.permute.xlu0 %326 }
 0x26e   :  { %v525_v12 = vpop.eup %524  ;;  %v431_v44 = vsel %vm429_vm5, %v430_v56, %v428_v57  ;;  %v345_v20 = vsel %vm338_vm0, %v887_v58, %v327_v59  ;;  %v329_v62 = vpop.permute.xlu1 %328  ;;  %v423_v58 = vand.u32 2147483648, %v912_v18 }
 0x26f   :  { %v527_v63 = vpop.eup %526  ;;  %470 = vst.msk [vmem:[%s1023_s3 + $0x10] sm:$0xff] %vm467_vm1, %v431_v44  ;;  %v433_v37 = vmul.f32 %v525_v12, %v910_v27  ;;  %353 = vst [vmem:[#allocation7 + $0x30] sm:$0xff] %v345_v20  ;;  %v346_v3 = vsel %vm338_vm0, %v884_v7, %v329_v62 }
 0x270   :  { %v419_v60 = vmul.f32 %v527_v63, %v912_v18  ;;  %354 = vst [vmem:[#allocation7 + $0x38] sm:$0xff] %v346_v3 }
 0x271   :  { %v435_v33 = vsel %vm434_vm6, %v910_v27, %v433_v37 }
 0x272   :  { %591 = shalt.err (!%p588_p6)
}
 0x273   :  { %s592_s19 = scalar_lea.hbm %s1022_s2, 1024 }
 0x274   :  { %p593_p7 = scmp.ne.s32.totalorder %s1022_s2, %s592_s19  ;;  %p596_p8 = scmp.lt.u32.totalorder %s592_s19, %s1022_s2 }
 0x276   :  { %p598_p9 = pnand %p596_p8, %p593_p7 }
 0x278   :  { %601 = shalt.err (!%p598_p9)
}
 0x279   :  { %487 = dma.vmem_to_hbm [thread:$0]  %s934_s13, 1024, %s1022_s2, [#allocation4], %s609_s22, %s609_s22, %s610_s23   ;;  %v529_v7 = vpop.eup %528  ;;  %v438_v47 = vsel %vm436_vm7, %v437_v6, %v435_v33  ;;  %v421_v10 = vsel %vm420_vm8, %v912_v18, %v419_v60  ;;  %vm422_vm9 = vcmp.eq.f32.partialorder %v912_v18, 0.0  ;;  %vm448_vm10 = vcmp.eq.f32.partialorder %v916_v30, inf }
 0x27a   :  { %v531_v11 = vpop.eup %530  ;;  %471 = vst.msk [vmem:[%s1023_s3 + $0x18] sm:$0xff] %vm467_vm1, %v438_v47  ;;  %v424_v0 = vsel %vm422_vm9, %v423_v58, %v421_v10  ;;  %v447_v46 = vmul.f32 %v529_v7, %v916_v30  ;;  %v451_v36 = vand.u32 2147483648, %v916_v30  ;;  %vm450_vm11 = vcmp.eq.f32.partialorder %v916_v30, 0.0 }
 0x27b   :  { %469 = vst.msk [vmem:[%s1023_s3 + $0x8] sm:$0xff] %vm467_vm1, %v424_v0  ;;  %v440_v2 = vmul.f32 %v531_v11, %v918_v19  ;;  %vm441_vm12 = vcmp.eq.f32.partialorder %v918_v19, inf  ;;  %v444_v40 = vand.u32 2147483648, %v918_v19  ;;  %v533_v61 = vpop.eup %532  ;;  %vm443_vm13 = vcmp.eq.f32.partialorder %v918_v19, 0.0 }
 0x27c   :  { %v449_v4 = vsel %vm448_vm10, %v916_v30, %v447_v46  ;;  %v535_v39 = vpop.eup %534  ;;  %v461_v49 = vmul.f32 %v533_v61, %v922_v13  ;;  %vm462_vm14 = vcmp.eq.f32.partialorder %v922_v13, inf  ;;  %v465_v5 = vand.u32 2147483648, %v922_v13 }
 0x27d   :  { %v452_v48 = vsel %vm450_vm11, %v451_v36, %v449_v4  ;;  %v442_v1 = vsel %vm441_vm12, %v918_v19, %v440_v2  ;;  %v454_v41 = vmul.f32 %v535_v39, %v928_v21  ;;  %vm464_vm15 = vcmp.eq.f32.partialorder %v922_v13, 0.0 }
 0x27e   :  { %473 = vst.msk [vmem:[%s1023_s3 + $0x28] sm:$0xff] %vm467_vm1, %v452_v48  ;;  %v445_v14 = vsel %vm443_vm13, %v444_v40, %v442_v1  ;;  %v463_v8 = vsel %vm462_vm14, %v922_v13, %v461_v49  ;;  %vm455_vm0 = vcmp.eq.f32.partialorder %v928_v21, inf  ;;  %v458_v42 = vand.u32 2147483648, %v928_v21 }
 0x27f   :  { %472 = vst.msk [vmem:[%s1023_s3 + $0x20] sm:$0xff] %vm467_vm1, %v445_v14  ;;  %v466_v50 = vsel %vm464_vm15, %v465_v5, %v463_v8  ;;  %v456_v51 = vsel %vm455_vm0, %v928_v21, %v454_v41  ;;  %vm457_vm2 = vcmp.eq.f32.partialorder %v928_v21, 0.0 }
 0x280   :  { %475 = vst.msk [vmem:[%s1023_s3 + $0x38] sm:$0xff] %vm467_vm1, %v466_v50  ;;  %v459_v15 = vsel %vm457_vm2, %v458_v42, %v456_v51 }
 0x281   :  { %474 = vst.msk [vmem:[%s1023_s3 + $0x30] sm:$0xff] %vm467_vm1, %v459_v15 }
 0x282   :  { %606 = dma.done.wait [#allocation4], 1024  }
 0x283   :  { %607 = vsyncadd [#allocation4], 4294966272 }
 0x284   :  { %495 = vsyncpa [#allocation3], 1 }
 0x285   :  { %496 = vsyncpa [#allocation6], 1 }
 0x286   :  { %497 = vsyncpa [#allocation4], 1 }

</bundles_post_ra>
